<compile_context>
chip_gen: v5e
topology: v5e:2x2
jax: 0.10.0
libtpu: 0.0.40
codegen_flags: <defaults>
</compile_context>

<pallas_src>
import math

import jax
import jax.numpy as jnp
from jax import lax
from jax.experimental import pallas as pl
from jax.experimental.pallas import tpu as pltpu

# ----------------------------- configuration --------------------------------
IN_CH = 4            # input_channels
IN_SAMPLES = 30      # input_sample_points
CLASSES = 3
NUM_FRAGS = 4
FRAG_LEN = math.ceil(IN_SAMPLES / NUM_FRAGS)      # 8
K = 5                                             # Conv1d kernel size
CONV_LEN = FRAG_LEN - K + 1                       # conv output length = 4
FEAT = CONV_LEN - 1                               # after MaxPool(k=2,s=1) = 3
CLIN = 5                                          # clinical feature count
BN_EPS = 1e-5

# column offsets inside the packed parameter slab (one (8,128) f32 tile)
_W1_COL = 8          # W1^T  (FEAT, 2)  at rows 0:FEAT, cols 8:10
_W2_COL = 16         # W2h^T (2, CLASSES) at rows 0:2, cols 16:16+CLASSES
_B_ROW = 4           # b1 at (4, 8:10), b2_eff at (4, 16:16+CLASSES)


# ------------------------------- kernel -------------------------------------
def sdrs_kernel(frag_ref, param_ref, scal_ref, out_ref):
    x = frag_ref[...]                              # (IN_CH, NUM_FRAGS, FRAG_LEN)
    P = param_ref[...]                             # (8, 128) — one vreg

    w = P[0:IN_CH, 0:K]                            # conv weight (IN_CH, K)
    w1t = P[0:FEAT, _W1_COL:_W1_COL + 2]           # (FEAT, 2)
    w2t = P[0:2, _W2_COL:_W2_COL + CLASSES]        # (2, CLASSES)
    b1 = P[_B_ROW:_B_ROW + 1, _W1_COL:_W1_COL + 2]             # (1, 2)
    b2 = P[_B_ROW:_B_ROW + 1, _W2_COL:_W2_COL + CLASSES]       # (1, CLASSES)

    conv_b = scal_ref[0]
    gamma = scal_ref[1]
    beta = scal_ref[2]

    # Conv1d(IN_CH -> 1, kernel_size=5, stride=1), batched over fragments.
    # Small static unroll over taps; channel reduction over the leading axis
    # (plain vreg adds) — no MXU involved.
    y = jnp.zeros((NUM_FRAGS, CONV_LEN), jnp.float32)
    for k in range(K):
        y = y + jnp.sum(x[:, :, k:k + CONV_LEN] * w[:, None, k:k + 1], axis=0)
    y = y + conv_b                                 # (NUM_FRAGS, CONV_LEN)

    # BatchNorm1d(1): training-mode batch stats (biased variance), computed
    # per fragment exactly as the torch per-fragment loop would.
    mean = jnp.mean(y, axis=1, keepdims=True)
    var = jnp.mean((y - mean) ** 2, axis=1, keepdims=True)
    y = (y - mean) * lax.rsqrt(var + BN_EPS) * gamma + beta

    # MaxPool1d(kernel_size=2, stride=1)
    p = jnp.maximum(y[:, :FEAT], y[:, 1:FEAT + 1])          # (NUM_FRAGS, FEAT)

    # Linear(FEAT -> 2) + ReLU — VPU broadcast-multiply + small reduce
    # (keep these tiny contractions off the MXU).
    h = jnp.sum(p[:, :, None] * w1t[None, :, :], axis=1) + b1
    h = jnp.maximum(h, 0.0)                                 # (NUM_FRAGS, 2)

    # Linear(2+CLIN -> CLASSES); the clinical contribution is fragment-invariant
    # and already folded into b2 on the host side.
    logits = jnp.sum(h[:, :, None] * w2t[None, :, :], axis=1) + b2

    # Softmax over classes (per fragment)
    m = jnp.max(logits, axis=1, keepdims=True)
    e = jnp.exp(logits - m)
    probs = e / jnp.sum(e, axis=1, keepdims=True)           # (NUM_FRAGS, CLASSES)

    # torch: cat(frags_out, dim=1) then mean(dim=1) == sum(probs) / (NF*CLASSES)
    out_ref[...] = jnp.sum(probs, keepdims=True) * (1.0 / (NUM_FRAGS * CLASSES))


# ------------------------------- wrapper -------------------------------------
@jax.jit
def sdrs_forward(x, conv_w, conv_b, bn_gamma, bn_beta, w1, b1, w2, b2, clinical):
    # split along time into NUM_FRAGS consecutive chunks, zero-padding the tail
    pad = NUM_FRAGS * FRAG_LEN - IN_SAMPLES
    frags = jnp.pad(x[0], ((0, 0), (0, pad))).reshape(IN_CH, NUM_FRAGS, FRAG_LEN)

    # fold the fragment-invariant clinical term into the classifier bias
    b2_eff = clinical[0] @ jnp.transpose(w2[:, 2:]) + b2          # (CLASSES,)

    # pack all small parameters into a single (8,128) f32 tile (one vreg, one DMA)
    slab = jnp.zeros((8, 128), jnp.float32)
    slab = slab.at[0:IN_CH, 0:K].set(conv_w)
    slab = slab.at[0:FEAT, _W1_COL:_W1_COL + 2].set(jnp.transpose(w1))
    slab = slab.at[0:2, _W2_COL:_W2_COL + CLASSES].set(jnp.transpose(w2[:, :2]))
    slab = slab.at[_B_ROW, _W1_COL:_W1_COL + 2].set(b1)
    slab = slab.at[_B_ROW, _W2_COL:_W2_COL + CLASSES].set(b2_eff)

    scalars = jnp.stack([conv_b, bn_gamma, bn_beta]).astype(jnp.float32)

    out = pl.pallas_call(
        sdrs_kernel,
        out_shape=jax.ShapeDtypeStruct((1, 1), jnp.float32),
        in_specs=[
            pl.BlockSpec(memory_space=pltpu.MemorySpace.VMEM),   # fragments
            pl.BlockSpec(memory_space=pltpu.MemorySpace.VMEM),   # param slab
            pl.BlockSpec(memory_space=pltpu.MemorySpace.SMEM),   # scalars
        ],
        out_specs=pl.BlockSpec(memory_space=pltpu.MemorySpace.VMEM),
    )(frags, slab, scalars)
    return out                                                   # (1, 1)


# --------------------------------- main --------------------------------------
if __name__ == "__main__":
    key = jax.random.PRNGKey(0)
    k0, k1, k2, k3, k4, k5 = jax.random.split(key, 6)

    # example input, torch layout (N=1, C, L)
    x = jax.random.normal(k0, (1, IN_CH, IN_SAMPLES), jnp.float32)

    # deterministic parameters (shapes follow the module __init__)
    conv_w = jax.random.normal(k1, (IN_CH, K), jnp.float32) * 0.2   # Conv1d(C,1,5)
    conv_b = jnp.float32(0.05)
    bn_gamma = jnp.float32(1.0)
    bn_beta = jnp.float32(0.0)

    w1 = jax.random.normal(k2, (2, FEAT), jnp.float32) * 0.3        # Linear(F,2)
    b1 = jax.random.normal(k3, (2,), jnp.float32) * 0.1
    w2 = jax.random.normal(k4, (CLASSES, 2 + CLIN), jnp.float32) * 0.3  # Linear(7,cls)
    b2 = jax.random.normal(k5, (CLASSES,), jnp.float32) * 0.1

    # TODO(synk): replaces the 'clinical data.csv' file read in the torch code.
    clinical = (jnp.arange(1.0, CLIN + 1.0, dtype=jnp.float32) * 0.1
                ).reshape(1, CLIN)

    out = sdrs_forward(x, conv_w, conv_b, bn_gamma, bn_beta,
                       w1, b1, w2, b2, clinical)
    out = jax.block_until_ready(out)

    # each fragment's softmax sums to 1, so mean over (NF*CLASSES) == 1/CLASSES
    assert out.shape == (1, 1)
    assert bool(jnp.all(jnp.isfinite(out)))
    assert bool(jnp.allclose(out, 1.0 / CLASSES, atol=1e-5))
    print("KERNEL_OK")
</pallas_src>

<mosaic_0001>
module attributes {stable_mosaic.version = 11 : i64} {
  func.func @sdrs_kernel(%arg0: memref<4x4x8xf32, #tpu.memory_space<vmem>>, %arg1: memref<8x128xf32, #tpu.memory_space<vmem>>, %arg2: memref<3xf32, #tpu.memory_space<smem>>, %arg3: memref<1x1xf32, #tpu.memory_space<vmem>>) attributes {dimension_semantics = [], scalar_prefetch = 0 : i64, scratch_operands = 0 : i64, tpu.core_type = #tpu.core_type<tc>} {
    %c0 = arith.constant 0 : index
    %c0_0 = arith.constant 0 : index
    %c0_1 = arith.constant 0 : index
    %0 = vector.load %arg0[%c0, %c0_0, %c0_1] : memref<4x4x8xf32, #tpu.memory_space<vmem>>, vector<4x4x8xf32>
    %c0_2 = arith.constant 0 : index
    %c0_3 = arith.constant 0 : index
    %1 = vector.load %arg1[%c0_2, %c0_3] : memref<8x128xf32, #tpu.memory_space<vmem>>, vector<8x128xf32>
    %2 = vector.extract_strided_slice %1 {offsets = [0, 0], sizes = [4, 5], strides = [1, 1]} : vector<8x128xf32> to vector<4x5xf32>
    %3 = vector.extract_strided_slice %1 {offsets = [0, 8], sizes = [3, 2], strides = [1, 1]} : vector<8x128xf32> to vector<3x2xf32>
    %4 = vector.extract_strided_slice %1 {offsets = [0, 16], sizes = [2, 3], strides = [1, 1]} : vector<8x128xf32> to vector<2x3xf32>
    %5 = vector.extract_strided_slice %1 {offsets = [4, 8], sizes = [1, 2], strides = [1, 1]} : vector<8x128xf32> to vector<1x2xf32>
    %6 = vector.extract_strided_slice %1 {offsets = [4, 16], sizes = [1, 3], strides = [1, 1]} : vector<8x128xf32> to vector<1x3xf32>
    %c0_4 = arith.constant 0 : index
    %7 = memref.load %arg2[%c0_4] : memref<3xf32, #tpu.memory_space<smem>>
    %c1 = arith.constant 1 : index
    %8 = memref.load %arg2[%c1] : memref<3xf32, #tpu.memory_space<smem>>
    %c2 = arith.constant 2 : index
    %9 = memref.load %arg2[%c2] : memref<3xf32, #tpu.memory_space<smem>>
    %cst = arith.constant 0.000000e+00 : f32
    %10 = vector.broadcast %cst : f32 to vector<4x4xf32>
    %11 = vector.extract_strided_slice %0 {offsets = [0, 0, 0], sizes = [4, 4, 4], strides = [1, 1, 1]} : vector<4x4x8xf32> to vector<4x4x4xf32>
    %12 = vector.extract_strided_slice %2 {offsets = [0, 0], sizes = [4, 1], strides = [1, 1]} : vector<4x5xf32> to vector<4x1xf32>
    %13 = vector.shape_cast %12 : vector<4x1xf32> to vector<4x1x1xf32>
    %14 = vector.broadcast %13 : vector<4x1x1xf32> to vector<4x4x4xf32>
    %15 = arith.mulf %11, %14 : vector<4x4x4xf32>
    %cst_5 = arith.constant dense<0.000000e+00> : vector<4x4xf32>
    %16 = vector.multi_reduction <add>, %15, %cst_5 [0] : vector<4x4x4xf32> to vector<4x4xf32>
    %17 = arith.addf %10, %16 : vector<4x4xf32>
    %18 = vector.extract_strided_slice %0 {offsets = [0, 0, 1], sizes = [4, 4, 4], strides = [1, 1, 1]} : vector<4x4x8xf32> to vector<4x4x4xf32>
    %19 = vector.extract_strided_slice %2 {offsets = [0, 1], sizes = [4, 1], strides = [1, 1]} : vector<4x5xf32> to vector<4x1xf32>
    %20 = vector.shape_cast %19 : vector<4x1xf32> to vector<4x1x1xf32>
    %21 = vector.broadcast %20 : vector<4x1x1xf32> to vector<4x4x4xf32>
    %22 = arith.mulf %18, %21 : vector<4x4x4xf32>
    %cst_6 = arith.constant dense<0.000000e+00> : vector<4x4xf32>
    %23 = vector.multi_reduction <add>, %22, %cst_6 [0] : vector<4x4x4xf32> to vector<4x4xf32>
    %24 = arith.addf %17, %23 : vector<4x4xf32>
    %25 = vector.extract_strided_slice %0 {offsets = [0, 0, 2], sizes = [4, 4, 4], strides = [1, 1, 1]} : vector<4x4x8xf32> to vector<4x4x4xf32>
    %26 = vector.extract_strided_slice %2 {offsets = [0, 2], sizes = [4, 1], strides = [1, 1]} : vector<4x5xf32> to vector<4x1xf32>
    %27 = vector.shape_cast %26 : vector<4x1xf32> to vector<4x1x1xf32>
    %28 = vector.broadcast %27 : vector<4x1x1xf32> to vector<4x4x4xf32>
    %29 = arith.mulf %25, %28 : vector<4x4x4xf32>
    %cst_7 = arith.constant dense<0.000000e+00> : vector<4x4xf32>
    %30 = vector.multi_reduction <add>, %29, %cst_7 [0] : vector<4x4x4xf32> to vector<4x4xf32>
    %31 = arith.addf %24, %30 : vector<4x4xf32>
    %32 = vector.extract_strided_slice %0 {offsets = [0, 0, 3], sizes = [4, 4, 4], strides = [1, 1, 1]} : vector<4x4x8xf32> to vector<4x4x4xf32>
    %33 = vector.extract_strided_slice %2 {offsets = [0, 3], sizes = [4, 1], strides = [1, 1]} : vector<4x5xf32> to vector<4x1xf32>
    %34 = vector.shape_cast %33 : vector<4x1xf32> to vector<4x1x1xf32>
    %35 = vector.broadcast %34 : vector<4x1x1xf32> to vector<4x4x4xf32>
    %36 = arith.mulf %32, %35 : vector<4x4x4xf32>
    %cst_8 = arith.constant dense<0.000000e+00> : vector<4x4xf32>
    %37 = vector.multi_reduction <add>, %36, %cst_8 [0] : vector<4x4x4xf32> to vector<4x4xf32>
    %38 = arith.addf %31, %37 : vector<4x4xf32>
    %39 = vector.extract_strided_slice %0 {offsets = [0, 0, 4], sizes = [4, 4, 4], strides = [1, 1, 1]} : vector<4x4x8xf32> to vector<4x4x4xf32>
    %40 = vector.extract_strided_slice %2 {offsets = [0, 4], sizes = [4, 1], strides = [1, 1]} : vector<4x5xf32> to vector<4x1xf32>
    %41 = vector.shape_cast %40 : vector<4x1xf32> to vector<4x1x1xf32>
    %42 = vector.broadcast %41 : vector<4x1x1xf32> to vector<4x4x4xf32>
    %43 = arith.mulf %39, %42 : vector<4x4x4xf32>
    %cst_9 = arith.constant dense<0.000000e+00> : vector<4x4xf32>
    %44 = vector.multi_reduction <add>, %43, %cst_9 [0] : vector<4x4x4xf32> to vector<4x4xf32>
    %45 = arith.addf %38, %44 : vector<4x4xf32>
    %46 = vector.broadcast %7 : f32 to vector<4x4xf32>
    %47 = arith.addf %45, %46 : vector<4x4xf32>
    %cst_10 = arith.constant dense<0.000000e+00> : vector<4xf32>
    %48 = vector.multi_reduction <add>, %47, %cst_10 [1] : vector<4x4xf32> to vector<4xf32>
    %49 = vector.shape_cast %48 : vector<4xf32> to vector<4x1xf32>
    %cst_11 = arith.constant 4.000000e+00 : f32
    %50 = vector.broadcast %cst_11 : f32 to vector<4x1xf32>
    %51 = arith.divf %49, %50 : vector<4x1xf32>
    %52 = vector.broadcast %51 : vector<4x1xf32> to vector<4x4xf32>
    %53 = arith.subf %47, %52 : vector<4x4xf32>
    %54 = arith.mulf %53, %53 : vector<4x4xf32>
    %cst_12 = arith.constant dense<0.000000e+00> : vector<4xf32>
    %55 = vector.multi_reduction <add>, %54, %cst_12 [1] : vector<4x4xf32> to vector<4xf32>
    %56 = vector.shape_cast %55 : vector<4xf32> to vector<4x1xf32>
    %cst_13 = arith.constant 4.000000e+00 : f32
    %57 = vector.broadcast %cst_13 : f32 to vector<4x1xf32>
    %58 = arith.divf %56, %57 : vector<4x1xf32>
    %59 = vector.broadcast %51 : vector<4x1xf32> to vector<4x4xf32>
    %60 = arith.subf %47, %59 : vector<4x4xf32>
    %cst_14 = arith.constant 9.99999974E-6 : f32
    %61 = vector.broadcast %cst_14 : f32 to vector<4x1xf32>
    %62 = arith.addf %58, %61 : vector<4x1xf32>
    %63 = math.rsqrt %62 : vector<4x1xf32>
    %64 = vector.broadcast %63 : vector<4x1xf32> to vector<4x4xf32>
    %65 = arith.mulf %60, %64 : vector<4x4xf32>
    %66 = vector.broadcast %8 : f32 to vector<4x4xf32>
    %67 = arith.mulf %65, %66 : vector<4x4xf32>
    %68 = vector.broadcast %9 : f32 to vector<4x4xf32>
    %69 = arith.addf %67, %68 : vector<4x4xf32>
    %70 = vector.extract_strided_slice %69 {offsets = [0, 0], sizes = [4, 3], strides = [1, 1]} : vector<4x4xf32> to vector<4x3xf32>
    %71 = vector.extract_strided_slice %69 {offsets = [0, 1], sizes = [4, 3], strides = [1, 1]} : vector<4x4xf32> to vector<4x3xf32>
    %72 = arith.maximumf %70, %71 : vector<4x3xf32>
    %73 = vector.shape_cast %72 : vector<4x3xf32> to vector<4x3x1xf32>
    %74 = vector.shape_cast %3 : vector<3x2xf32> to vector<1x3x2xf32>
    %75 = vector.broadcast %73 : vector<4x3x1xf32> to vector<4x3x2xf32>
    %76 = vector.broadcast %74 : vector<1x3x2xf32> to vector<4x3x2xf32>
    %77 = arith.mulf %75, %76 : vector<4x3x2xf32>
    %cst_15 = arith.constant dense<0.000000e+00> : vector<4x2xf32>
    %78 = vector.multi_reduction <add>, %77, %cst_15 [1] : vector<4x3x2xf32> to vector<4x2xf32>
    %79 = vector.broadcast %5 : vector<1x2xf32> to vector<4x2xf32>
    %80 = arith.addf %78, %79 : vector<4x2xf32>
    %cst_16 = arith.constant 0.000000e+00 : f32
    %81 = vector.broadcast %cst_16 : f32 to vector<4x2xf32>
    %82 = arith.maximumf %80, %81 : vector<4x2xf32>
    %83 = vector.shape_cast %82 : vector<4x2xf32> to vector<4x2x1xf32>
    %84 = vector.shape_cast %4 : vector<2x3xf32> to vector<1x2x3xf32>
    %85 = vector.broadcast %83 : vector<4x2x1xf32> to vector<4x2x3xf32>
    %86 = vector.broadcast %84 : vector<1x2x3xf32> to vector<4x2x3xf32>
    %87 = arith.mulf %85, %86 : vector<4x2x3xf32>
    %cst_17 = arith.constant dense<0.000000e+00> : vector<4x3xf32>
    %88 = vector.multi_reduction <add>, %87, %cst_17 [1] : vector<4x2x3xf32> to vector<4x3xf32>
    %89 = vector.broadcast %6 : vector<1x3xf32> to vector<4x3xf32>
    %90 = arith.addf %88, %89 : vector<4x3xf32>
    %cst_18 = arith.constant dense<0xFF800000> : vector<4xf32>
    %91 = vector.multi_reduction <maximumf>, %90, %cst_18 [1] : vector<4x3xf32> to vector<4xf32>
    %92 = vector.shape_cast %91 : vector<4xf32> to vector<4x1xf32>
    %93 = vector.broadcast %92 : vector<4x1xf32> to vector<4x3xf32>
    %94 = arith.subf %90, %93 : vector<4x3xf32>
    %95 = math.exp %94 : vector<4x3xf32>
    %cst_19 = arith.constant dense<0.000000e+00> : vector<4xf32>
    %96 = vector.multi_reduction <add>, %95, %cst_19 [1] : vector<4x3xf32> to vector<4xf32>
    %97 = vector.shape_cast %96 : vector<4xf32> to vector<4x1xf32>
    %98 = vector.broadcast %97 : vector<4x1xf32> to vector<4x3xf32>
    %99 = arith.divf %95, %98 : vector<4x3xf32>
    %100 = vector.shape_cast %99 : vector<4x3xf32> to vector<1x4x3xf32>
    %cst_20 = arith.constant dense<0.000000e+00> : vector<1xf32>
    %101 = vector.multi_reduction <add>, %100, %cst_20 [1, 2] : vector<1x4x3xf32> to vector<1xf32>
    %102 = vector.shape_cast %101 : vector<1xf32> to vector<1x1x1xf32>
    %103 = vector.extract %102[0, 0, 0] : f32 from vector<1x1x1xf32>
    %104 = vector.broadcast %103 : f32 to vector<1x1xf32>
    %cst_21 = arith.constant 0.0833333358 : f32
    %105 = vector.broadcast %cst_21 : f32 to vector<1x1xf32>
    %106 = arith.mulf %104, %105 : vector<1x1xf32>
    %c0_22 = arith.constant 0 : index
    %c0_23 = arith.constant 0 : index
    %107 = vector.load %arg3[%c0_22, %c0_23] : memref<1x1xf32, #tpu.memory_space<vmem>>, vector<1x1xf32>
    tpu.vector_store %arg3[%c0_22, %c0_23], %106 {strides = array<i32>} : memref<1x1xf32, #tpu.memory_space<vmem>>, vector<1x1xf32>,
    return
  }
}

</mosaic_0001>

<bundles_post_ra>
// kernel: sdrs_forward.1
= control target key start
LH: loop header
LB: loop body
LE: loop exit
PB: predicated region body
PF: predicated region fallthrough
CT: control target
= control target key end

     0   :  { %8 = vsyncpa [#allocation4], 0  ;;  %s814_s0 = inlined_call_operand.vmem [shape: f32[4,4,8], index: 0, kind: input, shape index: {}]   ;;  %s815_s1 = inlined_call_operand.vmem [shape: f32[8,128], index: 1, kind: input, shape index: {}]   ;;  %s816_s2 = inlined_call_operand.vmem [shape: f32[3], index: 2, kind: input, shape index: {}]   ;;  %s817_s3 = inlined_call_operand.hbm [shape: f32[1,1], index: 3, kind: output, shape index: {}]  }
   0x1   :  { %9 = vsyncpa [#allocation3], 0  ;;  %s19_s14 = sshll.u32 %s816_s2, 4  ;;  %s643_s15 = smov [#allocation2]   ;;  %s20_s14 = int_to_ptr.vmem [resolvable:$true] %s19_s14 }
   0x2   :  { %22 = dma.vmem_to_smem %s20_s14, 16, %s643_s15, [#allocation4]  }
   0x3   :  { %639 = dma.done.wait [#allocation4], 16  }
   0x4   :  { %640 = vsyncadd [#allocation4], 4294967280 }
   0x5   :  { %27 = sfence }
   0x6   :  { %v682_v0 = vld [vmem:[%s815_s1] sm:$0xff]  ;;  %v644_v1 = vmov 1   ;;  %v645_v5 = vmov 2   ;;  %v646_v10 = vmov 3   ;;  %v647_v11 = vmov 4   ;;  %s649_s24 = smov 127  }
   0x7   :  { %564 = vset.pattern.permute.xlu0 %v644_v1  ;;  %v40_v2 = vperm.slane %v682_v0, 0  ;;  %565 = vset.pattern.permute.xlu1 %v644_v1  ;;  %v38_v3 = vrot.slane %v682_v0, 2  ;;  %v37_v4 = vrot.slane %v682_v0, 1  ;;  %v39_v8 = vrot.slane %v682_v0, 3  ;;  %v691_v17 = vld [vmem:[%s814_s0] sm:$0xf] }
   0x8   :  { %567 = vset.pattern.permute.xlu2 %v645_v5  ;;  %v648_v12 = vmov 0   ;;  %v697_v20 = vld [vmem:[%s814_s0 + $0x8] sm:$0xf]  ;;  %v702_v21 = vld [vmem:[%s814_s0 + $0x4] sm:$0xf]  ;;  %vm93_vm0 = vcmask 35848  }
   0x9   :  { %74 = vperm.xlu0 %564, %v40_v2   ;;  %v42_v6 = vperm.slane %v38_v3, 0  ;;  %v41_v7 = vperm.slane %v37_v4, 0  ;;  %v43_v9 = vperm.slane %v39_v8, 0  ;;  %v707_v22 = vld [vmem:[%s814_s0 + $0xc] sm:$0xf]  ;;  %vm159_vm1 = vcmask 52248  }
   0xa   :  { %vm126_vm2 = vcmask 44048   ;;  %s650_s0 = smov 125   ;;  %s651_s25 = smov 126   ;;  %vm192_vm3 = vcmask 60448   ;;  %vm64_vm4 = vcmask 27648   ;;  %vm277_vm9 = vcmask 75840  }
   0xb   :  { %82 = vperm.xlu1 %565, %v42_v6   ;;  %111 = vperm.xlu2 %567, %v41_v7   ;;  %s652_s26 = smov 124   ;;  %s33_s27 = sld [smem:[#allocation2]]  ;;  %vm347_vm10 = vcmask 148608   ;;  %vm385_vm11 = vcmask 1041409   ;;  %vm388_vm12 = vcmask 1042434   ;;  %vm391_vm13 = vcmask 1043459  }
   0xc   :  { %s547_s28 = sld [smem:[#allocation2 + $0x1]]  ;;  %vm394_vm14 = vcmask 150656   ;;  %s654_s30 = smov 112   ;;  %vm431_vm15 = vcmask 19456  }
   0xd   :  { %s548_s29 = sld [smem:[#allocation2 + $0x2]]  ;;  %s655_s4 = smov [#allocation5]  }
   0xe   :  { %s535_s5 = sshll.u32 %s655_s4, 4  ;;  %s537_s8 = sshll.u32 %s817_s3, 4  ;;  %s536_s5 = int_to_ptr.vmem [resolvable:$true] %s535_s5  ;;  %s538_s8 = int_to_ptr.hbm [resolvable:$true] %s537_s8 }
  0x11   :  { %78 = vperm.xlu0 %564, %v41_v7  }
  0x13   :  { %566 = vset.pattern.permute.xlu1 %v645_v5  ;;  %568 = vset.pattern.permute.xlu2 %v644_v1 }
  0x14   :  { %107 = vperm.xlu1 %566, %v40_v2   ;;  %86 = vperm.xlu2 %568, %v43_v9  }
  0x19   :  { %569 = vset.pattern.permute.xlu0 %v645_v5 }
  0x1a   :  { %115 = vperm.xlu0 %569, %v42_v6  }
  0x1c   :  { %570 = vset.pattern.permute.xlu1 %v646_v10  ;;  %571 = vset.pattern.permute.xlu2 %v646_v10 }
  0x1d   :  { %140 = vperm.xlu1 %570, %v40_v2   ;;  %144 = vperm.xlu2 %571, %v41_v7  }
  0x22   :  { %573 = vset.pattern.permute.xlu0 %v647_v11 }
  0x23   :  { %173 = vperm.xlu0 %573, %v40_v2  }
  0x25   :  { %572 = vset.pattern.permute.xlu1 %v645_v5  ;;  %148 = vperm.xlu2 %571, %v42_v6  }
  0x26   :  { %119 = vperm.xlu1 %572, %v43_v9  }
  0x2b   :  { %576 = vset.pattern.permute.xlu0 %v648_v12 }
  0x2c   :  { %45 = vperm.xlu0 %576, %v40_v2  }
  0x2d   :  { %152 = vperm.xlu2 %571, %v43_v9  }
  0x2e   :  { %574 = vset.pattern.permute.xlu1 %v647_v11 }
  0x2f   :  { %177 = vperm.xlu1 %574, %v41_v7  }
  0x35   :  { %575 = vset.pattern.permute.xlu2 %v647_v11 }
  0x36   :  { %185 = vperm.xlu2 %575, %v43_v9  }
  0x37   :  { %181 = vperm.xlu1 %574, %v42_v6  }
  0x3e   :  { %578 = vset.pattern.permute.xlu2 %v648_v12 }
  0x3f   :  { %577 = vset.pattern.permute.xlu1 %v648_v12  ;;  %53 = vperm.xlu2 %578, %v42_v6  }
  0x40   :  { %49 = vperm.xlu1 %577, %v41_v7  }
  0x48   :  { %57 = vperm.xlu1 %577, %v43_v9  }
  0x65   :  { %v112_v13 = vpop.permute.xlu2 %111 }
  0x66   :  { %v123_v46 = vmul.f32 %v112_v13, %v702_v21 }
  0x68   :  { %v128_v53 = vsel %vm126_vm2, %v123_v46, 0.0 }
  0x6e   :  { %v87_v14 = vpop.permute.xlu2 %86 }
  0x6f   :  { %v92_v28 = vmul.f32 %v87_v14, %v707_v22 }
  0x71   :  { %v99_v34 = vsel %vm93_vm0, %v92_v28, 0.0 }
  0x77   :  { %v145_v15 = vpop.permute.xlu2 %144 }
  0x78   :  { %v156_v36 = vmul.f32 %v145_v15, %v702_v21 }
  0x7a   :  { %v161_v43 = vsel %vm159_vm1, %v156_v36, 0.0 }
  0x7b   :  { %v75_v16 = vpop.permute.xlu0 %74 }
  0x7c   :  { %v89_v19 = vmul.f32 %v75_v16, %v691_v17 }
  0x7d   :  { %v83_v18 = vpop.permute.xlu1 %82 }
  0x7e   :  { %v94_v24 = vsel %vm93_vm0, %v89_v19, 0.0  ;;  %v91_v25 = vmul.f32 %v83_v18, %v697_v20 }
  0x7f   :  { %v149_v27 = vpop.permute.xlu2 %148 }
  0x80   :  { %v97_v32 = vsel %vm93_vm0, %v91_v25, 0.0  ;;  %v157_v39 = vmul.f32 %v149_v27, %v697_v20 }
  0x82   :  { %v163_v49 = vsel %vm159_vm1, %v157_v39, 0.0 }
  0x83   :  { %v79_v23 = vpop.permute.xlu0 %78 }
  0x84   :  { %v90_v26 = vmul.f32 %v79_v23, %v702_v21 }
  0x86   :  { %v95_v29 = vsel %vm93_vm0, %v90_v26, 0.0  ;;  %v108_v30 = vpop.permute.xlu1 %107 }
  0x87   :  { %v96_v31 = vadd.f32 %v95_v29, %v94_v24  ;;  %v153_v37 = vpop.permute.xlu2 %152  ;;  %v122_v42 = vmul.f32 %v108_v30, %v691_v17 }
  0x88   :  { %v158_v44 = vmul.f32 %v153_v37, %v707_v22  ;;  %v205_v37 = vstv %s33_s27 }
  0x89   :  { %v98_v33 = vadd.f32 %v97_v32, %v96_v31  ;;  %v127_v50 = vsel %vm126_vm2, %v122_v42, 0.0 }
  0x8a   :  { %v165_v52 = vsel %vm159_vm1, %v158_v44, 0.0  ;;  %v129_v56 = vadd.f32 %v128_v53, %v127_v50 }
  0x8b   :  { %v100_v35 = vadd.f32 %v99_v34, %v98_v33 }
  0x8c   :  { %v116_v40 = vpop.permute.xlu0 %115 }
  0x8d   :  { %102 = vrot.lane.b32.xlu2 %v100_v35, %s649_s24  ;;  %v124_v47 = vmul.f32 %v116_v40, %v697_v20 }
  0x8f   :  { %v141_v38 = vpop.permute.xlu1 %140  ;;  %v130_v54 = vsel %vm126_vm2, %v124_v47, 0.0 }
  0x90   :  { %v155_v41 = vmul.f32 %v141_v38, %v691_v17  ;;  %v131_v59 = vadd.f32 %v130_v54, %v129_v56  ;;  %v186_v3 = vpop.permute.xlu2 %185 }
  0x91   :  { %v191_v6 = vmul.f32 %v186_v3, %v707_v22 }
  0x92   :  { %v160_v45 = vsel %vm159_vm1, %v155_v41, 0.0  ;;  %v653_v41 = vmov 4.0  }
  0x93   :  { %v162_v48 = vadd.f32 %v161_v43, %v160_v45  ;;  %v198_v11 = vsel %vm192_vm3, %v191_v6, 0.0  ;;  %583 = vrcp.f32 %v653_v41 }
  0x95   :  { %v164_v51 = vadd.f32 %v163_v49, %v162_v48  ;;  %v174_v62 = vpop.permute.xlu0 %173 }
  0x96   :  { %v188_v2 = vmul.f32 %v174_v62, %v691_v17 }
  0x97   :  { %v166_v55 = vadd.f32 %v165_v52, %v164_v51  ;;  %v246_v52 = vlaneseq }
  0x98   :  { %v120_v57 = vpop.permute.xlu1 %119  ;;  %v193_v5 = vsel %vm192_vm3, %v188_v2, 0.0  ;;  %v236_v2 = vstv %s547_s28 }
  0x99   :  { %v125_v58 = vmul.f32 %v120_v57, %v707_v22  ;;  %168 = vrot.lane.b32.xlu1 %v166_v55, %s650_s0  ;;  %v54_v14 = vpop.permute.xlu2 %53  ;;  %v247_v53 = vshrl.u32 %v246_v52, 7 }
  0x9a   :  { %v62_v18 = vmul.f32 %v54_v14, %v697_v20 }
  0x9b   :  { %v132_v60 = vsel %vm126_vm2, %v125_v58, 0.0  ;;  %v318_v56 = vadd.s32 8, %v247_v53  ;;  %579 = vset.pattern.permute.xlu2 %v247_v53 }
  0x9c   :  { %v133_v61 = vadd.f32 %v132_v60, %v131_v59  ;;  %v68_v26 = vsel %vm64_vm4, %v62_v18, 0.0 }
  0x9d   :  { %581 = vset.pattern.permute.xlu0 %v318_v56  ;;  %582 = vset.pattern.permute.xlu1 %v318_v56 }
  0x9e   :  { %135 = vrot.lane.b32.xlu0 %v133_v61, %s651_s25  ;;  %v46_v12 = vpop.permute.xlu0 %45 }
  0x9f   :  { %v60_v16 = vmul.f32 %v46_v12, %v691_v17 }
  0xa1   :  { %v178_v63 = vpop.permute.xlu1 %177  ;;  %v65_v24 = vsel %vm64_vm4, %v60_v16, 0.0 }
  0xa2   :  { %v189_v1 = vmul.f32 %v178_v63, %v702_v21 }
  0xa4   :  { %v194_v4 = vsel %vm192_vm3, %v189_v1, 0.0 }
  0xa5   :  { %v195_v7 = vadd.f32 %v194_v4, %v193_v5  ;;  %v238_v4 = vstv %s548_s29 }
  0xa9   :  { %v182_v8 = vpop.permute.xlu1 %181 }
  0xaa   :  { %v190_v9 = vmul.f32 %v182_v8, %v697_v20 }
  0xac   :  { %v196_v10 = vsel %vm192_vm3, %v190_v9, 0.0 }
  0xad   :  { %v197_v13 = vadd.f32 %v196_v10, %v195_v7 }
  0xaf   :  { %v199_v15 = vadd.f32 %v198_v11, %v197_v13 }
  0xb1   :  { %201 = vrot.lane.b32.xlu2 %v199_v15, %s652_s26 }
  0xb2   :  { %v50_v19 = vpop.permute.xlu1 %49 }
  0xb3   :  { %v61_v23 = vmul.f32 %v50_v19, %v702_v21 }
  0xb5   :  { %v66_v25 = vsel %vm64_vm4, %v61_v23, 0.0 }
  0xb6   :  { %v67_v27 = vadd.f32 %v66_v25, %v65_v24 }
  0xb8   :  { %v69_v28 = vadd.f32 %v68_v26, %v67_v27 }
  0xba   :  { %v58_v29 = vpop.permute.xlu1 %57 }
  0xbb   :  { %v63_v30 = vmul.f32 %v58_v29, %v707_v22  ;;  %v584_v22 = vpop.eup %583  ;;  %v745_v29 = vperm.slane %v682_v0, 4 }
  0xbc   :  { %v211_v42 = vmul.f32 4.0, %v584_v22  ;;  %vm215_vm5 = vweird.f32 %v584_v22 }
  0xbd   :  { %v70_v17 = vsel %vm64_vm4, %v63_v30, 0.0 }
  0xbe   :  { %v71_v31 = vadd.f32 %v70_v17, %v69_v28  ;;  %v212_v43 = vsub.f32 1.0, %v211_v42 }
  0xc0   :  { %v213_v44 = vmul.f32 %v584_v22, %v212_v43 }
  0xc2   :  { %v214_v45 = vadd.f32 %v584_v22, %v213_v44 }
  0xc4   :  { %v216_v46 = vsel %vm215_vm5, %v584_v22, %v214_v45 }
  0xe7   :  { %v103_v32 = vpop.permute.xlu2 %102 }
  0xe8   :  { %v105_v20 = vadd.f32 %v103_v32, %v71_v31 }
 0x10b   :  { %v169_v21 = vpop.permute.xlu1 %168  ;;  %v202_v36 = vpop.permute.xlu2 %201 }
 0x110   :  { %v136_v33 = vpop.permute.xlu0 %135 }
 0x111   :  { %v138_v34 = vadd.f32 %v136_v33, %v105_v20 }
 0x113   :  { %v171_v35 = vadd.f32 %v169_v21, %v138_v34 }
 0x115   :  { %v204_v38 = vadd.f32 %v202_v36, %v171_v35 }
 0x117   :  { %v206_v39 = vadd.f32 %v205_v37, %v204_v38 }
 0x119   :  { %v207_v40 = vsel %vm64_vm4, %v206_v39, 0.0 }
 0x11a   :  { %208 = vadd.xlane.f32.xlu0 %v207_v40 }
 0x18d   :  { %v209_v47 = vpop.xlane.xlu0 %208 }
 0x18e   :  { %v217_v48 = vmul.f32 %v216_v46, %v209_v47 }
 0x190   :  { %v218_v49 = vsub.f32 %v206_v39, %v217_v48 }
 0x192   :  { %v219_v50 = vmul.f32 %v218_v49, %v218_v49 }
 0x194   :  { %v220_v51 = vsel %vm64_vm4, %v219_v50, 0.0 }
 0x195   :  { %221 = vadd.xlane.f32.xlu1 %v220_v51 }
 0x208   :  { %v222_v54 = vpop.xlane.xlu1 %221 }
 0x209   :  { %v223_v55 = vmul.f32 %v222_v54, %v216_v46 }
 0x20b   :  { %v224_v57 = vadd.f32 1e-05, %v223_v55 }
 0x20d   :  { %585 = vrsqrt.f32 %v224_v57  ;;  %vm231_vm7 = vweird.f32 %v224_v57 }
 0x213   :  { %v586_v58 = vpop.eup %585 }
 0x214   :  { %v226_v59 = vmul.f32 %v586_v58, %v224_v57  ;;  %vm232_vm6 = vweird.f32 %v586_v58 }
 0x215   :  { %vm233_vm8 = vmor %vm231_vm7, %vm232_vm6 }
 0x216   :  { %v227_v60 = vmul.f32 %v586_v58, %v226_v59 }
 0x218   :  { %v228_v61 = vmul.f32 0.5, %v227_v60 }
 0x21a   :  { %v229_v62 = vsub.f32 1.5, %v228_v61 }
 0x21c   :  { %v230_v63 = vmul.f32 %v586_v58, %v229_v62 }
 0x21e   :  { %v234_v1 = vsel %vm233_vm8, %v586_v58, %v230_v63 }
 0x21f   :  { %v235_v3 = vmul.f32 %v234_v1, %v218_v49 }
 0x221   :  { %v237_v5 = vmul.f32 %v236_v2, %v235_v3 }
 0x223   :  { %v239_v6 = vadd.f32 %v238_v4, %v237_v5 }
 0x225   :  { %241 = vrot.lane.b32.xlu2 %v239_v6, %s649_s24 }
 0x27f   :  { %v242_v7 = vpop.permute.xlu2 %241 }
 0x280   :  { %v244_v8 = vmax.f32 %v239_v6, %v242_v7 }
 0x282   :  { %v252_v9 = vperm.slane %v244_v8, 1  ;;  %v259_v10 = vperm.slane %v244_v8, 2  ;;  %v245_v11 = vperm.slane %v244_v8, 0  ;;  %v266_v12 = vperm.slane %v244_v8, 3 }
 0x284   :  { %257 = vperm.xlu2 %579, %v252_v9  }
 0x28c   :  { %264 = vperm.xlu2 %579, %v259_v10  }
 0x294   :  { %250 = vperm.xlu2 %579, %v245_v11  }
 0x29c   :  { %271 = vperm.xlu2 %579, %v266_v12  }
 0x2a4   :  { %580 = vset.pattern.permute.xlu2 %v318_v56 }
 0x2de   :  { %v258_v13 = vpop.permute.xlu2 %257 }
 0x2df   :  { %v274_v14 = vmul.f32 %v258_v13, %v682_v0 }
 0x2e1   :  { %v285_v15 = vsel %vm277_vm9, %v274_v14, 0.0 }
 0x2e2   :  { %v286_v16 = vrot.slane %v285_v15, 4 }
 0x2e4   :  { %v287_v18 = vadd.f32 %v286_v16, %v285_v15 }
 0x2e6   :  { %v288_v19 = vrot.slane %v287_v18, 2  ;;  %v265_v23 = vpop.permute.xlu2 %264 }
 0x2e7   :  { %v275_v24 = vmul.f32 %v265_v23, %v682_v0 }
 0x2e8   :  { %v289_v25 = vadd.f32 %v288_v19, %v287_v18 }
 0x2e9   :  { %v292_v26 = vsel %vm277_vm9, %v275_v24, 0.0 }
 0x2ea   :  { %v290_v27 = vrot.slane %v289_v25, 1  ;;  %v293_v28 = vrot.slane %v292_v26, 4 }
 0x2ec   :  { %v294_v30 = vadd.f32 %v293_v28, %v292_v26  ;;  %v291_v17 = vadd.f32 %v290_v27, %v289_v25 }
 0x2ee   :  { %v295_v31 = vrot.slane %v294_v30, 2  ;;  %v251_v32 = vpop.permute.xlu2 %250  ;;  %v308_v20 = vadd.f32 %v745_v29, %v291_v17 }
 0x2ef   :  { %v273_v33 = vmul.f32 %v251_v32, %v682_v0 }
 0x2f0   :  { %v296_v34 = vadd.f32 %v295_v31, %v294_v30  ;;  %v312_v21 = vmax.f32 %v308_v20, 0.0 }
 0x2f1   :  { %v278_v35 = vsel %vm277_vm9, %v273_v33, 0.0 }
 0x2f2   :  { %v297_v36 = vrot.slane %v296_v34, 1  ;;  %v279_v37 = vrot.slane %v278_v35, 4  ;;  %v322_v38 = vperm.slane %v312_v21, 0 }
 0x2f4   :  { %v280_v39 = vadd.f32 %v279_v37, %v278_v35  ;;  %327 = vperm.xlu2 %580, %v322_v38   ;;  %v298_v40 = vadd.f32 %v297_v36, %v296_v34 }
 0x2f6   :  { %v281_v41 = vrot.slane %v280_v39, 2  ;;  %v272_v22 = vpop.permute.xlu2 %271  ;;  %v309_v42 = vadd.f32 %v745_v29, %v298_v40 }
 0x2f7   :  { %v276_v43 = vmul.f32 %v272_v22, %v682_v0 }
 0x2f8   :  { %v282_v44 = vadd.f32 %v281_v41, %v280_v39  ;;  %v313_v45 = vmax.f32 %v309_v42, 0.0 }
 0x2f9   :  { %v299_v46 = vsel %vm277_vm9, %v276_v43, 0.0 }
 0x2fa   :  { %v283_v47 = vrot.slane %v282_v44, 1  ;;  %v300_v48 = vrot.slane %v299_v46, 4  ;;  %v329_v49 = vperm.slane %v313_v45, 0 }
 0x2fc   :  { %v301_v50 = vadd.f32 %v300_v48, %v299_v46  ;;  %334 = vperm.xlu0 %581, %v329_v49   ;;  %v284_v51 = vadd.f32 %v283_v47, %v282_v44 }
 0x2fe   :  { %v302_v52 = vrot.slane %v301_v50, 2  ;;  %v307_v53 = vadd.f32 %v745_v29, %v284_v51 }
 0x300   :  { %v303_v54 = vadd.f32 %v302_v52, %v301_v50  ;;  %v311_v55 = vmax.f32 %v307_v53, 0.0 }
 0x302   :  { %v304_v56 = vrot.slane %v303_v54, 1  ;;  %v315_v57 = vperm.slane %v311_v55, 0 }
 0x304   :  { %320 = vperm.xlu1 %582, %v315_v57   ;;  %v305_v58 = vadd.f32 %v304_v56, %v303_v54 }
 0x306   :  { %v310_v59 = vadd.f32 %v745_v29, %v305_v58 }
 0x308   :  { %v314_v60 = vmax.f32 %v310_v59, 0.0 }
 0x30a   :  { %v336_v61 = vperm.slane %v314_v60, 0 }
 0x30c   :  { %341 = vperm.xlu2 %580, %v336_v61  }
 0x34e   :  { %v328_v62 = vpop.permute.xlu2 %327 }
 0x34f   :  { %v344_v63 = vmul.f32 %v328_v62, %v682_v0 }
 0x351   :  { %v355_v2 = vsel %vm347_vm10, %v344_v63, 0.0 }
 0x352   :  { %v356_v5 = vrot.slane %v355_v2, 4 }
 0x354   :  { %v357_v7 = vadd.f32 %v356_v5, %v355_v2 }
 0x356   :  { %v358_v12 = vrot.slane %v357_v7, 2 }
 0x358   :  { %v359_v16 = vadd.f32 %v358_v12, %v357_v7 }
 0x35a   :  { %v360_v27 = vrot.slane %v359_v16, 1 }
 0x35c   :  { %v361_v32 = vadd.f32 %v360_v27, %v359_v16 }
 0x35e   :  { %v377_v35 = vadd.f32 %v361_v32, %v745_v29 }
 0x360   :  { %v384_v40 = vrot.slane %v377_v35, 7 }
 0x366   :  { %v342_v1 = vpop.permute.xlu2 %341 }
 0x367   :  { %v346_v3 = vmul.f32 %v342_v1, %v682_v0 }
 0x369   :  { %v369_v4 = vsel %vm347_vm10, %v346_v3, 0.0 }
 0x36a   :  { %v370_v6 = vrot.slane %v369_v4, 4 }
 0x36c   :  { %v371_v10 = vadd.f32 %v370_v6, %v369_v4 }
 0x36e   :  { %v335_v8 = vpop.permute.xlu0 %334  ;;  %v372_v14 = vrot.slane %v371_v10, 2 }
 0x36f   :  { %v345_v9 = vmul.f32 %v335_v8, %v682_v0 }
 0x370   :  { %v373_v24 = vadd.f32 %v372_v14, %v371_v10 }
 0x371   :  { %v362_v11 = vsel %vm347_vm10, %v345_v9, 0.0 }
 0x372   :  { %v363_v13 = vrot.slane %v362_v11, 4  ;;  %v374_v17 = vrot.slane %v373_v24, 1 }
 0x374   :  { %v364_v15 = vadd.f32 %v363_v13, %v362_v11  ;;  %v375_v34 = vadd.f32 %v374_v17, %v373_v24 }
 0x376   :  { %v365_v18 = vrot.slane %v364_v15, 2  ;;  %v321_v19 = vpop.permute.xlu1 %320  ;;  %v379_v38 = vadd.f32 %v375_v34, %v745_v29 }
 0x377   :  { %v343_v23 = vmul.f32 %v321_v19, %v682_v0 }
 0x378   :  { %v366_v25 = vadd.f32 %v365_v18, %v364_v15  ;;  %v390_v42 = vrot.slane %v379_v38, 5 }
 0x379   :  { %v348_v26 = vsel %vm347_vm10, %v343_v23, 0.0 }
 0x37a   :  { %v349_v28 = vrot.slane %v348_v26, 4  ;;  %v367_v30 = vrot.slane %v366_v25, 1 }
 0x37c   :  { %v350_v31 = vadd.f32 %v349_v28, %v348_v26  ;;  %v368_v33 = vadd.f32 %v367_v30, %v366_v25 }
 0x37e   :  { %v351_v20 = vrot.slane %v350_v31, 2  ;;  %v378_v37 = vadd.f32 %v368_v33, %v745_v29 }
 0x380   :  { %v352_v21 = vadd.f32 %v351_v20, %v350_v31  ;;  %v387_v41 = vrot.slane %v378_v37, 6 }
 0x382   :  { %v353_v36 = vrot.slane %v352_v21, 1 }
 0x384   :  { %v354_v0 = vadd.f32 %v353_v36, %v352_v21 }
 0x386   :  { %v376_v39 = vadd.f32 %v354_v0, %v745_v29 }
 0x388   :  { %v386_v22 = vsel %vm385_vm11, %v384_v40, %v376_v39 }
 0x389   :  { %v389_v43 = vsel %vm388_vm12, %v387_v41, %v386_v22 }
 0x38a   :  { %v392_v44 = vsel %vm391_vm13, %v390_v42, %v389_v43 }
 0x38b   :  { %v395_v45 = vsel %vm394_vm14, %v392_v44, -inf }
 0x38c   :  { %396 = vmax.xlane.f32.xlu2 %v395_v45 }
 0x3ff   :  { %v397_v46 = vpop.xlane.xlu2 %396 }
 0x400   :  { %v399_v47 = vrot.slane %v397_v46, 1  ;;  %v400_v48 = vrot.slane %v397_v46, 2  ;;  %v401_v49 = vrot.slane %v397_v46, 3  ;;  %v406_v50 = vsub.f32 %v376_v39, %v397_v46 }
 0x402   :  { %v407_v29 = vsub.f32 %v377_v35, %v399_v47  ;;  %v408_v51 = vsub.f32 %v378_v37, %v400_v48  ;;  %v409_v52 = vsub.f32 %v379_v38, %v401_v49  ;;  %v410_v53 = vmul.f32 1.442695, %v406_v50 }
 0x404   :  { %v412_v54 = vmul.f32 1.442695, %v407_v29  ;;  %v414_v55 = vmul.f32 1.442695, %v408_v51  ;;  %v416_v56 = vmul.f32 1.442695, %v409_v52  ;;  %587 = vpow2.f32 %v410_v53 }
 0x406   :  { %589 = vpow2.f32 %v412_v54 }
 0x407   :  { %591 = vpow2.f32 %v414_v55 }
 0x408   :  { %593 = vpow2.f32 %v416_v56 }
 0x40a   :  { %v770_v57 = vpop.eup %587 }
 0x40c   :  { %v772_v58 = vpop.eup %589 }
 0x40d   :  { %v774_v59 = vpop.eup %591  ;;  %v422_v60 = vrot.slane %v772_v58, 7 }
 0x40e   :  { %v777_v61 = vpop.eup %593  ;;  %v424_v62 = vrot.slane %v774_v59, 6 }
 0x40f   :  { %v423_v63 = vsel %vm385_vm11, %v422_v60, %v770_v57  ;;  %v426_v1 = vrot.slane %v777_v61, 5 }
 0x410   :  { %v425_v2 = vsel %vm388_vm12, %v424_v62, %v423_v63 }
 0x411   :  { %v427_v3 = vsel %vm391_vm13, %v426_v1, %v425_v2 }
 0x412   :  { %428 = vrot.lane.b32.xlu1 %v427_v3, %s654_s30 }
 0x484   :  { %v429_v4 = vpop.permute.xlu1 %428 }
 0x485   :  { %v432_v5 = vsel %vm431_vm15, %v429_v4, 0.0 }
 0x486   :  { %433 = vadd.xlane.f32.xlu1 %v432_v5 }
 0x4f9   :  { %v434_v6 = vpop.xlane.xlu1 %433 }
 0x4fa   :  { %v436_v7 = vrot.slane %v434_v6, 1  ;;  %v437_v8 = vrot.slane %v434_v6, 2  ;;  %v438_v9 = vrot.slane %v434_v6, 3  ;;  %595 = vrcp.f32 %v434_v6 }
 0x4fb   :  { %v454_v11 = vand.u32 2147483648, %v434_v6  ;;  %v452_v12 = vand.u32 2147483647, %v434_v6  ;;  %vm448_vm0 = vweird.f32 %v434_v6 }
 0x4fc   :  { %597 = vrcp.f32 %v436_v7  ;;  %vm463_vm1 = vweird.f32 %v436_v7  ;;  %v467_v19 = vand.u32 2147483647, %v436_v7  ;;  %v469_v26 = vand.u32 2147483648, %v436_v7 }
 0x4fd   :  { %599 = vrcp.f32 %v437_v8  ;;  %v455_v24 = vor.u32 1.1754944e-38, %v454_v11  ;;  %vm787_vm2 = vcmp.eq.f32.partialorder %v452_v12, 8.507059e+37  ;;  %vm478_vm4 = vweird.f32 %v437_v8 }
 0x4fe   :  { %601 = vrcp.f32 %v438_v9  ;;  %v482_v32 = vand.u32 2147483647, %v437_v8  ;;  %v484_v20 = vand.u32 2147483648, %v437_v8  ;;  %v497_v37 = vand.u32 2147483647, %v438_v9 }
 0x4ff   :  { %v499_v0 = vand.u32 2147483648, %v438_v9  ;;  %vm468_vm10 = vcmp.eq.f32.partialorder %v467_v19, 8.507059e+37  ;;  %v470_v41 = vor.u32 1.1754944e-38, %v469_v26  ;;  %vm493_vm14 = vweird.f32 %v438_v9 }
 0x500   :  { %v596_v10 = vpop.eup %595  ;;  %v485_v43 = vor.u32 1.1754944e-38, %v484_v20 }
 0x501   :  { %v444_v13 = vmul.f32 %v596_v10, %v434_v6  ;;  %vm449_vm3 = vweird.f32 %v596_v10  ;;  %v500_v48 = vor.u32 1.1754944e-38, %v499_v0 }
 0x502   :  { %v598_v14 = vpop.eup %597  ;;  %vm792_vm6 = vmor %vm448_vm0, %vm449_vm3  ;;  %vm483_vm3 = vcmp.eq.f32.partialorder %v482_v32, 8.507059e+37 }
 0x503   :  { %v600_v15 = vpop.eup %599  ;;  %v445_v16 = vsub.f32 1.0, %v444_v13  ;;  %v459_v18 = vmul.f32 %v598_v14, %v436_v7  ;;  %vm464_vm5 = vweird.f32 %v598_v14 }
 0x504   :  { %v602_v23 = vpop.eup %601  ;;  %v474_v27 = vmul.f32 %v600_v15, %v437_v8  ;;  %vm479_vm7 = vweird.f32 %v600_v15  ;;  %vm465_vm9 = vmor %vm463_vm1, %vm464_vm5  ;;  %vm498_vm1 = vcmp.eq.f32.partialorder %v497_v37, 8.507059e+37 }
 0x505   :  { %v446_v28 = vmul.f32 %v596_v10, %v445_v16  ;;  %v460_v30 = vsub.f32 1.0, %v459_v18  ;;  %v489_v17 = vmul.f32 %v602_v23, %v438_v9  ;;  %vm494_vm8 = vweird.f32 %v602_v23  ;;  %vm480_vm0 = vmor %vm478_vm4, %vm479_vm7 }
 0x506   :  { %v475_v31 = vsub.f32 1.0, %v474_v27 }
 0x507   :  { %v447_v33 = vadd.f32 %v596_v10, %v446_v28  ;;  %v461_v34 = vmul.f32 %v598_v14, %v460_v30  ;;  %v490_v21 = vsub.f32 1.0, %v489_v17 }
 0x508   :  { %v476_v36 = vmul.f32 %v600_v15, %v475_v31 }
 0x509   :  { %v451_v38 = vsel %vm792_vm6, %v596_v10, %v447_v33  ;;  %v462_v39 = vadd.f32 %v598_v14, %v461_v34  ;;  %v491_v40 = vmul.f32 %v602_v23, %v490_v21  ;;  %vm495_vm6 = vmor %vm493_vm14, %vm494_vm8 }
 0x50a   :  { %v477_v22 = vadd.f32 %v600_v15, %v476_v36  ;;  %v456_v45 = vsel %vm787_vm2, %v455_v24, %v451_v38 }
 0x50b   :  { %v466_v42 = vsel %vm465_vm9, %v598_v14, %v462_v39  ;;  %v492_v44 = vadd.f32 %v602_v23, %v491_v40  ;;  %v457_v53 = vmul.f32 %v770_v57, %v456_v45 }
 0x50c   :  { %v471_v46 = vsel %vm468_vm10, %v470_v41, %v466_v42  ;;  %v481_v47 = vsel %vm480_vm0, %v600_v15, %v477_v22 }
 0x50d   :  { %v472_v49 = vmul.f32 %v772_v58, %v471_v46  ;;  %v486_v50 = vsel %vm483_vm3, %v485_v43, %v481_v47  ;;  %v496_v29 = vsel %vm495_vm6, %v602_v23, %v492_v44 }
 0x50e   :  { %v487_v51 = vmul.f32 %v774_v59, %v486_v50  ;;  %v501_v52 = vsel %vm498_vm1, %v500_v48, %v496_v29 }
 0x50f   :  { %v502_v54 = vmul.f32 %v777_v61, %v501_v52  ;;  %v507_v55 = vrot.slane %v472_v49, 7 }
 0x510   :  { %v509_v56 = vrot.slane %v487_v51, 6 }
 0x511   :  { %v508_v60 = vsel %vm385_vm11, %v507_v55, %v457_v53  ;;  %v511_v62 = vrot.slane %v502_v54, 5  ;;  %vm528_vm11 = vcmask 0  }
 0x512   :  { %v510_v63 = vsel %vm388_vm12, %v509_v56, %v508_v60 }
 0x513   :  { %v512_v1 = vsel %vm391_vm13, %v511_v62, %v510_v63 }
 0x514   :  { %513 = vrot.lane.b32.xlu0 %v512_v1, %s654_s30 }
 0x586   :  { %v514_v58 = vpop.permute.xlu0 %513 }
 0x587   :  { %v516_v2 = vsel %vm431_vm15, %v514_v58, 0.0 }
 0x588   :  { %517 = vadd.xlane.f32.xlu0 %v516_v2 }
 0x5fb   :  { %v518_v59 = vpop.xlane.xlu0 %517 }
 0x5fc   :  { %v519_v3 = vrot.slane %v518_v59, 4 }
 0x5fe   :  { %v520_v57 = vadd.f32 %v519_v3, %v518_v59 }
 0x600   :  { %v521_v4 = vrot.slane %v520_v57, 2 }
 0x602   :  { %v522_v61 = vadd.f32 %v521_v4, %v520_v57 }
 0x604   :  { %v523_v5 = vrot.slane %v522_v61, 1 }
 0x606   :  { %v524_v6 = vadd.f32 %v523_v5, %v522_v61 }
 0x608   :  { %549 = vpush %v524_v6 }
 0x639   :  { %s550_s9 = spop %549 }
 0x63a   :  { %v526_v7 = vstv %s550_s9 }
 0x63b   :  { %v527_v8 = vmul.f32 0.083333336, %v526_v7 }
 0x63d   :  { %529 = vst.msk [vmem:[#allocation5] sm:$0x1] %vm528_vm11, %v527_v8 }
 0x63e   :  { %540 = dma.vmem_to_hbm [thread:$0]  %s536_s5, 16, %s538_s8, [#allocation3]  }
 0x63f   :  { %641 = dma.done.wait [#allocation3], 16  }
 0x640   :  { %642 = vsyncadd [#allocation3], 4294967280 }
 0x641   :  { %545 = vsyncpa [#allocation3], 1 }
 0x642   :  { %546 = vsyncpa [#allocation4], 1 }

</bundles_post_ra>
